<compile_context>
chip_gen: v5e
topology: v5e:2x2
jax: 0.10.0
libtpu: 0.0.40
codegen_flags: <defaults>
</compile_context>

<pallas_src>
import functools

import jax
import jax.numpy as jnp
from jax.experimental import pallas as pl
from jax.experimental.pallas import tpu as pltpu


def _ce_label_smooth_kernel(alpha, n_classes, total_rows, tb,
                            logits_ref, labels_ref, out_ref):
    x = logits_ref[...].astype(jnp.float32)                    # (TB, N)
    n = x.shape[-1]

    # Numerically stable log_softmax pieces (z and lse are reused below).
    m = jnp.max(x, axis=-1, keepdims=True)                     # (TB, 1)
    z = x - m
    lse = jnp.log(jnp.sum(jnp.exp(z), axis=-1, keepdims=True))  # (TB, 1)

    # sum_j logp_j = sum_j z_j - N * lse   (no (B,N) target tensor needed)
    sum_z = jnp.sum(z, axis=-1, keepdims=True)                  # (TB, 1)
    sum_logp = sum_z - jnp.float32(n) * lse                     # (TB, 1)

    # logp at the true class via iota-compare + masked lane sum (no scatter).
    col = jax.lax.broadcasted_iota(jnp.int32, x.shape, 1)
    is_true = col == labels_ref[...]                            # (TB, N)
    z_label = jnp.sum(jnp.where(is_true, z, 0.0), axis=-1, keepdims=True)
    logp_label = z_label - lse                                  # (TB, 1)

    on_w = jnp.float32(1.0 - alpha)
    off_w = jnp.float32(alpha / (n_classes - 1)) if n_classes > 1 else jnp.float32(0.0)
    per_row = -on_w * logp_label - off_w * (sum_logp - logp_label)  # (TB, 1)

    # Mask padded rows of a ragged last batch tile.
    row = pl.program_id(0) * tb + jax.lax.broadcasted_iota(
        jnp.int32, per_row.shape, 0)
    per_row = jnp.where(row < total_rows, per_row, 0.0)

    tile_sum = jnp.sum(per_row)

    # Lane-dense per-tile partial: write the scalar into [0, 0, 0] of a full
    # (1, 8, 128) block so the store is a single unmasked vreg write.
    sub = jax.lax.broadcasted_iota(jnp.int32, out_ref.shape, 1)
    lane = jax.lax.broadcasted_iota(jnp.int32, out_ref.shape, 2)
    out_ref[...] = jnp.where((sub == 0) & (lane == 0), tile_sum, jnp.float32(0.0))


def ce_label_smoothed_loss(y_pred, y_true, n_classes, alpha=0.0, block_rows=None):
    """y_pred: [B, N] float logits; y_true: [B] integer labels. Returns scalar f32."""
    B, N = y_pred.shape
    assert N == n_classes

    itemsize = jnp.dtype(y_pred.dtype).itemsize
    sub_mult = {4: 8, 2: 16, 1: 32}.get(itemsize, 8)

    if block_rows is None:
        # ~4 MiB per logits buffer -> 2x-buffered tile stays well inside the
        # scoped VMEM default on every generation (incl. v7x's 64 MiB VMEM).
        budget_bytes = 4 * 1024 * 1024
        rows = budget_bytes // max(1, N * itemsize)
        rows = max(sub_mult, min(512, rows))
        block_rows = (rows // sub_mult) * sub_mult
    tb = max(sub_mult, (int(block_rows) // sub_mult) * sub_mult)

    b_pad = ((B + tb - 1) // tb) * tb
    num_tiles = b_pad // tb

    labels = y_true.astype(jnp.int32).reshape(B, 1)
    if b_pad != B:
        y_pred = jnp.pad(y_pred, ((0, b_pad - B), (0, 0)))
        labels = jnp.pad(labels, ((0, b_pad - B), (0, 0)))

    kernel = functools.partial(
        _ce_label_smooth_kernel, float(alpha), int(n_classes), int(B), int(tb))

    cost = pl.CostEstimate(
        flops=5 * B * N,
        transcendentals=B * N,
        bytes_accessed=(b_pad * N * itemsize            # logits
                        + b_pad * 4                     # labels
                        + num_tiles * 8 * 128 * 4),     # partial sums
    )

    partials = pl.pallas_call(
        kernel,
        out_shape=jax.ShapeDtypeStruct((num_tiles, 8, 128), jnp.float32),
        grid=(num_tiles,),
        in_specs=[
            pl.BlockSpec((tb, N), lambda i: (i, 0)),    # logits tile (native dtype)
            pl.BlockSpec((tb, 1), lambda i: (i, 0)),    # labels tile
        ],
        out_specs=pl.BlockSpec((1, 8, 128), lambda i: (i, 0, 0)),
        compiler_params=pltpu.CompilerParams(dimension_semantics=("parallel",)),
        cost_estimate=cost,
    )(y_pred, labels)

    # Global mean over the ORIGINAL batch size (division done once, here).
    return jnp.sum(partials) / jnp.float32(B)


def _reference(y_pred, y_true, n_classes, alpha):
    logp = jax.nn.log_softmax(y_pred.astype(jnp.float32), axis=-1)
    onehot = jax.nn.one_hot(y_true, n_classes, dtype=jnp.float32)
    target = onehot * (1.0 - alpha) + (1.0 - onehot) * (alpha / (n_classes - 1))
    return jnp.mean(jnp.sum(-target * logp, axis=-1))


if __name__ == "__main__":
    key = jax.random.PRNGKey(0)
    k1, k2 = jax.random.split(key)

    B, N = 8, 32          # batch=8, n_classes=32
    alpha = 0.1

    y_pred = jax.random.normal(k1, (B, N), dtype=jnp.float32)
    y_true = jax.random.randint(k2, (B,), 0, N, dtype=jnp.int32)

    loss = ce_label_smoothed_loss(y_pred, y_true, n_classes=N, alpha=alpha)
    loss = jax.block_until_ready(loss)

    ref = _reference(y_pred, y_true, N, alpha)
    assert jnp.allclose(loss, ref, rtol=1e-5, atol=1e-5), (loss, ref)

    # Also exercise a ragged, multi-tile batch to check padding/masking.
    B2 = 37
    yp2 = jax.random.normal(k1, (B2, N), dtype=jnp.float32)
    yt2 = jax.random.randint(k2, (B2,), 0, N, dtype=jnp.int32)
    loss2 = jax.block_until_ready(
        ce_label_smoothed_loss(yp2, yt2, n_classes=N, alpha=alpha, block_rows=16))
    ref2 = _reference(yp2, yt2, N, alpha)
    assert jnp.allclose(loss2, ref2, rtol=1e-5, atol=1e-5), (loss2, ref2)

    print("KERNEL_OK")
</pallas_src>

<mosaic_0001>
module attributes {stable_mosaic.version = 11 : i64} {
  func.func @_ce_label_smooth_kernel(%arg0: i32, %arg1: memref<512x32xf32, #tpu.memory_space<vmem>>, %arg2: memref<512x1xi32, #tpu.memory_space<vmem>>, %arg3: memref<1x8x128xf32, #tpu.memory_space<vmem>>) attributes {dimension_semantics = [#tpu.dimension_semantics<parallel>], iteration_bounds = array<i64: 1>, scalar_prefetch = 0 : i64, scratch_operands = 0 : i64, tpu.core_type = #tpu.core_type<tc>, window_params = [{transform_indices = @transform_0, window_bounds = array<i64: 512, 32>}, {transform_indices = @transform_1, window_bounds = array<i64: 512, 1>}, {transform_indices = @transform_2, window_bounds = array<i64: 1, 8, 128>}]} {
    %c0 = arith.constant 0 : index
    %c0_0 = arith.constant 0 : index
    %0 = vector.load %arg1[%c0, %c0_0] : memref<512x32xf32, #tpu.memory_space<vmem>>, vector<512x32xf32>
    %cst = arith.constant dense<0xFF800000> : vector<512xf32>
    %1 = vector.multi_reduction <maximumf>, %0, %cst [1] : vector<512x32xf32> to vector<512xf32>
    %2 = vector.shape_cast %1 : vector<512xf32> to vector<512x1xf32>
    %3 = vector.broadcast %2 : vector<512x1xf32> to vector<512x32xf32>
    %4 = arith.subf %0, %3 : vector<512x32xf32>
    %5 = math.exp %4 : vector<512x32xf32>
    %cst_1 = arith.constant dense<0.000000e+00> : vector<512xf32>
    %6 = vector.multi_reduction <add>, %5, %cst_1 [1] : vector<512x32xf32> to vector<512xf32>
    %7 = vector.shape_cast %6 : vector<512xf32> to vector<512x1xf32>
    %8 = math.log %7 : vector<512x1xf32>
    %cst_2 = arith.constant dense<0.000000e+00> : vector<512xf32>
    %9 = vector.multi_reduction <add>, %4, %cst_2 [1] : vector<512x32xf32> to vector<512xf32>
    %10 = vector.shape_cast %9 : vector<512xf32> to vector<512x1xf32>
    %cst_3 = arith.constant 3.200000e+01 : f32
    %11 = vector.broadcast %cst_3 : f32 to vector<512x1xf32>
    %12 = arith.mulf %11, %8 : vector<512x1xf32>
    %13 = arith.subf %10, %12 : vector<512x1xf32>
    %14 = tpu.iota {dimensions = array<i32: 1>} : vector<512x32xi32>
    %c0_4 = arith.constant 0 : index
    %c0_5 = arith.constant 0 : index
    %15 = vector.load %arg2[%c0_4, %c0_5] : memref<512x1xi32, #tpu.memory_space<vmem>>, vector<512x1xi32>
    %16 = vector.broadcast %15 : vector<512x1xi32> to vector<512x32xi32>
    %17 = arith.cmpi eq, %14, %16 : vector<512x32xi32>
    %cst_6 = arith.constant 0.000000e+00 : f32
    %18 = vector.broadcast %cst_6 : f32 to vector<512x32xf32>
    %19 = arith.select %17, %4, %18 : vector<512x32xi1>, vector<512x32xf32>
    %cst_7 = arith.constant dense<0.000000e+00> : vector<512xf32>
    %20 = vector.multi_reduction <add>, %19, %cst_7 [1] : vector<512x32xf32> to vector<512xf32>
    %21 = vector.shape_cast %20 : vector<512xf32> to vector<512x1xf32>
    %22 = arith.subf %21, %8 : vector<512x1xf32>
    %cst_8 = arith.constant 0.000000e+00 : f32
    %cst_9 = arith.constant 0.899999976 : f32
    %23 = arith.subf %cst_8, %cst_9 : f32
    %24 = vector.broadcast %23 : f32 to vector<512x1xf32>
    %25 = arith.mulf %24, %22 : vector<512x1xf32>
    %26 = arith.subf %13, %22 : vector<512x1xf32>
    %cst_10 = arith.constant 0.0032258064 : f32
    %27 = vector.broadcast %cst_10 : f32 to vector<512x1xf32>
    %28 = arith.mulf %27, %26 : vector<512x1xf32>
    %29 = arith.subf %25, %28 : vector<512x1xf32>
    %c512_i32 = arith.constant 512 : i32
    %30 = arith.muli %arg0, %c512_i32 : i32
    %31 = tpu.iota {dimensions = array<i32: 0>} : vector<512x1xi32>
    %32 = vector.broadcast %30 : i32 to vector<512x1xi32>
    %33 = arith.addi %32, %31 : vector<512x1xi32>
    %c8_i32 = arith.constant 8 : i32
    %34 = vector.broadcast %c8_i32 : i32 to vector<512x1xi32>
    %35 = arith.cmpi slt, %33, %34 : vector<512x1xi32>
    %cst_11 = arith.constant 0.000000e+00 : f32
    %36 = vector.broadcast %cst_11 : f32 to vector<512x1xf32>
    %37 = arith.select %35, %29, %36 : vector<512x1xi1>, vector<512x1xf32>
    %38 = vector.shape_cast %37 : vector<512x1xf32> to vector<1x512x1xf32>
    %cst_12 = arith.constant dense<0.000000e+00> : vector<1xf32>
    %39 = vector.multi_reduction <add>, %38, %cst_12 [1, 2] : vector<1x512x1xf32> to vector<1xf32>
    %40 = vector.shape_cast %39 : vector<1xf32> to vector<1x1x1xf32>
    %41 = vector.extract %40[0, 0, 0] : f32 from vector<1x1x1xf32>
    %42 = tpu.iota {dimensions = array<i32: 1>} : vector<1x8x128xi32>
    %43 = tpu.iota {dimensions = array<i32: 2>} : vector<1x8x128xi32>
    %c0_i32 = arith.constant 0 : i32
    %44 = vector.broadcast %c0_i32 : i32 to vector<1x8x128xi32>
    %45 = arith.cmpi eq, %42, %44 : vector<1x8x128xi32>
    %c0_i32_13 = arith.constant 0 : i32
    %46 = vector.broadcast %c0_i32_13 : i32 to vector<1x8x128xi32>
    %47 = arith.cmpi eq, %43, %46 : vector<1x8x128xi32>
    %48 = arith.andi %45, %47 : vector<1x8x128xi1>
    %cst_14 = arith.constant 0.000000e+00 : f32
    %49 = vector.broadcast %41 : f32 to vector<1x8x128xf32>
    %50 = vector.broadcast %cst_14 : f32 to vector<1x8x128xf32>
    %51 = arith.select %48, %49, %50 : vector<1x8x128xi1>, vector<1x8x128xf32>
    %c0_15 = arith.constant 0 : index
    %c0_16 = arith.constant 0 : index
    %c0_17 = arith.constant 0 : index
    %52 = vector.load %arg3[%c0_15, %c0_16, %c0_17] : memref<1x8x128xf32, #tpu.memory_space<vmem>>, vector<1x8x128xf32>
    tpu.vector_store %arg3[%c0_15, %c0_16, %c0_17], %51 {strides = array<i32>} : memref<1x8x128xf32, #tpu.memory_space<vmem>>, vector<1x8x128xf32>,
    return
  }
  func.func @transform_0(%arg0: i32) -> (i32, i32) {
    %c0_i32 = arith.constant 0 : i32
    %c0_i32_0 = arith.constant 0 : i32
    return %arg0, %c0_i32 : i32, i32
  }
  func.func @transform_1(%arg0: i32) -> (i32, i32) {
    %c0_i32 = arith.constant 0 : i32
    %c0_i32_0 = arith.constant 0 : i32
    return %arg0, %c0_i32 : i32, i32
  }
  func.func @transform_2(%arg0: i32) -> (i32, i32, i32) {
    %c0_i32 = arith.constant 0 : i32
    %c0_i32_0 = arith.constant 0 : i32
    %c0_i32_1 = arith.constant 0 : i32
    return %arg0, %c0_i32, %c0_i32_0 : i32, i32, i32
  }
}

</mosaic_0001>

<bundles_post_ra>
// kernel: tpu_custom_call.1
= control target key start
LH: loop header
LB: loop body
LE: loop exit
PB: predicated region body
PF: predicated region fallthrough
CT: control target
= control target key end

     0   :  { %vm76_vm0 = vcmask 261120   ;;  %s2482_s0 = inlined_call_operand.vmem [shape: f32[512,32], index: 0, kind: input, shape index: {}]   ;;  %s2483_s1 = inlined_call_operand.vmem [shape: s32[512,1], index: 1, kind: input, shape index: {}]   ;;  %s2484_s2 = inlined_call_operand.hbm [shape: f32[1,8,128], index: 2, kind: output, shape index: {}]  }
   0x1   :  { %v12_v0 = vld [vmem:[%s2482_s0] sm:$0xff] }
   0x2   :  { %7 = vsyncpa [#allocation3], 0  ;;  %v77_v1 = vsel %vm76_vm0, %v12_v0, -inf  ;;  %v2452_v2 = vmov 0   ;;  %v1103_v3 = vld [vmem:[%s2483_s1] sm:$0xff]  ;;  %v1101_v9 = vlaneseq  ;;  %vm2258_vm2 = vcmask 7168  }
   0x3   :  { %2421 = vset.pattern.permute.xlu0 %v2452_v2  ;;  %s2453_s0 = smov [#allocation2]   ;;  %s2408_s15 = sshll.u32 %s2484_s2, 4  ;;  %s2409_s15 = int_to_ptr.hbm [resolvable:$true] %s2408_s15 }
   0x4   :  { %78 = vmax.xlane.f32.xlu0 %v77_v1  ;;  %v1102_v10 = vand.u32 127, %v1101_v9  ;;  %v2001_v35 = vshrl.u32 %v1101_v9, 7  ;;  %s2406_s1 = sshll.u32 %s2453_s0, 4  ;;  %s2407_s1 = int_to_ptr.vmem [resolvable:$true] %s2406_s1 }
   0x6   :  { %vm2395_vm3 = vcmp.eq.s32.totalorder %v2001_v35, 0  ;;  %vm2396_vm4 = vcmp.eq.s32.totalorder %v1102_v10, 0 }
   0x7   :  { %vm2397_vm5 = vmand %vm2395_vm3, %vm2396_vm4 }
  0x18   :  { %1168 = vperm.xlu0 %2421, %v1103_v3  }
  0x77   :  { %v79_v4 = vpop.xlane.xlu0 %78 }
  0x78   :  { %v269_v5 = vsub.f32 %v12_v0, %v79_v4 }
  0x7a   :  { %v333_v6 = vmul.f32 1.442695, %v269_v5  ;;  %v781_v12 = vsel %vm76_vm0, %v269_v5, 0.0 }
  0x7c   :  { %2422 = vpow2.f32 %v333_v6 }
  0x82   :  { %v2423_v7 = vpop.eup %2422 }
  0x83   :  { %v461_v8 = vsel %vm76_vm0, %v2423_v7, 0.0 }
  0x84   :  { %462 = vadd.xlane.f32.xlu1 %v461_v8 }
  0x8a   :  { %v1169_v11 = vpop.permute.xlu0 %1168 }
  0x8b   :  { %vm1359_vm1 = vcmp.eq.s32.totalorder %v1102_v10, %v1169_v11 }
  0x8c   :  { %782 = vadd.xlane.f32.xlu1 %v781_v12  ;;  %v1423_v13 = vsel %vm1359_vm1, %v269_v5, 0.0 }
  0x8d   :  { %v1487_v14 = vsel %vm76_vm0, %v1423_v13, 0.0 }
  0x8e   :  { %1488 = vadd.xlane.f32.xlu2 %v1487_v14 }
  0xf7   :  { %v463_v15 = vpop.xlane.xlu1 %462 }
  0xf8   :  { %2424 = vlog2.f32 %v463_v15 }
  0xfe   :  { %v2425_v16 = vpop.eup %2424 }
  0xff   :  { %v654_v17 = vmul.f32 0.6931472, %v2425_v16  ;;  %v783_v20 = vpop.xlane.xlu1 %782 }
 0x101   :  { %v973_v18 = vmul.f32 32.0, %v654_v17  ;;  %v1489_v19 = vpop.xlane.xlu2 %1488 }
 0x102   :  { %v1679_v21 = vsub.f32 %v1489_v19, %v654_v17 }
 0x103   :  { %v1037_v22 = vsub.f32 %v783_v20, %v973_v18 }
 0x104   :  { %v1743_v24 = vmul.f32 -0.9, %v1679_v21 }
 0x105   :  { %v1807_v23 = vsub.f32 %v1037_v22, %v1679_v21 }
 0x107   :  { %v1871_v25 = vmul.f32 0.0032258064, %v1807_v23 }
 0x109   :  { %v1935_v26 = vsub.f32 %v1743_v24, %v1871_v25 }
 0x10b   :  { %v2259_v27 = vsel %vm2258_vm2, %v1935_v26, 0.0 }
 0x10c   :  { %2386 = vadd.xlane.f32.xlu2 %v2259_v27 }
 0x17f   :  { %v2387_v28 = vpop.xlane.xlu2 %2386 }
 0x180   :  { %v2388_v29 = vrot.slane %v2387_v28, 4 }
 0x182   :  { %v2389_v30 = vadd.f32 %v2388_v29, %v2387_v28 }
 0x184   :  { %v2390_v31 = vrot.slane %v2389_v30, 2 }
 0x186   :  { %v2391_v32 = vadd.f32 %v2390_v31, %v2389_v30 }
 0x188   :  { %v2392_v33 = vrot.slane %v2391_v32, 1 }
 0x18a   :  { %v2393_v34 = vadd.f32 %v2392_v33, %v2391_v32 }
 0x18c   :  { %2417 = vpush %v2393_v34 }
 0x1bd   :  { %s2418_s16 = spop %2417 }
 0x1be   :  { %v2398_v36 = vstv %s2418_s16 }
 0x1bf   :  { %v2399_v37 = vsel %vm2397_vm5, %v2398_v36, 0.0 }
 0x1c0   :  { %2400 = vst [vmem:[#allocation2] sm:$0xff] %v2399_v37 }
 0x1c1   :  { %2411 = dma.vmem_to_hbm [thread:$0]  %s2407_s1, 128, %s2409_s15, [#allocation3]  }
 0x1c2   :  { %2450 = dma.done.wait [#allocation3], 128  }
 0x1c3   :  { %2451 = vsyncadd [#allocation3], 4294967168 }
 0x1c4   :  { %2416 = vsyncpa [#allocation3], 1 }

</bundles_post_ra>
